<compile_context>
chip_gen: v7x
topology: tpu7x:2x2x1
jax: 0.10.0
libtpu: 0.0.40
codegen_flags: <defaults>
</compile_context>

<pallas_src>
import jax
import jax.numpy as jnp
from jax.experimental import pallas as pl
from jax.experimental.pallas import tpu as pltpu

N_ITER = 4  # self.n_iter = 4 in the PyTorch module


# ----------------------------------------------------------------------------
# Kernel: the entire 4-iteration regression collapses to one affine map.
#   out = xf @ wa_s + beff_s
# Everything resident in VMEM, no grid.
# ----------------------------------------------------------------------------
def jointnet_kernel(xf_ref, wa_ref, beff_ref, out_ref):
    out_ref[...] = (
        jnp.dot(xf_ref[...], wa_ref[...], preferred_element_type=jnp.float32)
        + beff_ref[...]
    )


def jointnet_forward(xf, folded):
    B = xf.shape[0]
    npose = folded["wa_s"].shape[1]
    vmem = pl.BlockSpec(memory_space=pltpu.MemorySpace.VMEM)
    return pl.pallas_call(
        jointnet_kernel,
        out_shape=jax.ShapeDtypeStruct((B, npose), jnp.float32),
        in_specs=[vmem, vmem, vmem],
        out_specs=vmem,
    )(xf, folded["wa_s"], folded["beff_s"])


# ----------------------------------------------------------------------------
# Raw (module-shaped) parameters, mirroring the PyTorch module:
#   fc_pose_1: Linear(feature_channel + npose, 1024)
#   fc_pose_2: Linear(1024, 1024)
#   decpose:   Linear(1024, npose)   (xavier_uniform, gain=0.01)
# Weights stored pre-transposed as (in_features, out_features).
# ----------------------------------------------------------------------------
def init_params(key, feature_channel, npose, hidden=1024):
    k1, k2, k3 = jax.random.split(key, 3)

    def xavier(k, fan_in, fan_out, gain=1.0):
        limit = gain * jnp.sqrt(6.0 / (fan_in + fan_out))
        return jax.random.uniform(k, (fan_in, fan_out), jnp.float32,
                                  -limit, limit)

    w1 = xavier(k1, feature_channel + npose, hidden)
    return {
        "w1a": w1[:feature_channel],          # xf half of fc_pose_1
        "w1b": w1[feature_channel:],          # pred_pose half of fc_pose_1
        "b1": jnp.zeros((1, hidden), jnp.float32),
        "w2": xavier(k2, hidden, hidden),
        "b2": jnp.zeros((1, hidden), jnp.float32),
        "w3": xavier(k3, hidden, npose, gain=0.01),
        "b3": jnp.zeros((1, npose), jnp.float32),
    }


def fold_params(params, batch_size, n_iter=N_ITER):
    """One-time offline fold of the whole forward pass (EVAL MODE ONLY:
    dropout is identity at inference; gate this fold on inference).

    Step 1 (linear-chain fold):
        Wa = W1a@W2@W3, Wb = W1b@W2@W3, b_eff = b1@W2@W3 + b2@W3 + b3
        so each iteration is  pred' = xf@Wa + pred@Wb + b_eff + pred.
    Step 2 (recurrence fold):
        pred' = base + pred@M with M = I + Wb and pred_0 = 0, so after
        n_iter steps  out = base @ S,  S = sum_{k=0..n_iter-1} M^k.
        Pre-multiply: wa_s = Wa@S, beff_s = b_eff@S (broadcast to (B,npose)).
    """
    w23 = params["w2"] @ params["w3"]                        # (1024, npose)
    wa = params["w1a"] @ w23                                 # (F, npose)
    wb = params["w1b"] @ w23                                 # (npose, npose)
    beff = params["b1"] @ w23 + params["b2"] @ params["w3"] + params["b3"]

    npose = wb.shape[0]
    eye = jnp.eye(npose, dtype=jnp.float32)
    m = eye + wb
    s = eye
    for _ in range(n_iter - 1):
        s = eye + s @ m                                      # I + M + ... + M^k

    return {
        "wa_s": wa @ s,                                      # (F, npose)
        "beff_s": jnp.broadcast_to(beff @ s, (batch_size, npose)),  # (B, npose)
    }


# ----------------------------------------------------------------------------
# Pure-JAX reference of the PyTorch forward (eval mode), UNFOLDED — used to
# verify that the algebraic folding preserves semantics.
# ----------------------------------------------------------------------------
def jointnet_ref(xf, params):
    B = xf.shape[0]
    npose = params["b3"].shape[-1]
    pred = jnp.zeros((B, npose), jnp.float32)
    w1 = jnp.concatenate([params["w1a"], params["w1b"]], axis=0)
    for _ in range(N_ITER):
        xc = jnp.concatenate([xf, pred], axis=1)
        h1 = xc @ w1 + params["b1"]            # fc_pose_1 (+ drop1 = identity)
        h2 = h1 @ params["w2"] + params["b2"]  # fc_pose_2 (+ drop2 = identity)
        pred = h2 @ params["w3"] + params["b3"] + pred  # decpose + residual
    return pred


if __name__ == "__main__":
    key = jax.random.PRNGKey(0)
    kx, kp = jax.random.split(key)

    B, FEAT, NPOSE = 8, 32, 24
    xf = jax.random.normal(kx, (B, FEAT), jnp.float32)
    params = init_params(kp, FEAT, NPOSE)
    folded = fold_params(params, batch_size=B)

    out = jointnet_forward(xf, folded)
    jax.block_until_ready(out)

    assert out.shape == (B, NPOSE), out.shape
    ref = jointnet_ref(xf, params)
    # Tolerance loosened slightly: folding reassociates f32 sums over K=1024
    # and through small 24x24 matrix powers.
    assert jnp.allclose(out, ref, atol=1e-4, rtol=1e-3), \
        float(jnp.max(jnp.abs(out - ref)))

    print("KERNEL_OK")
</pallas_src>

<mosaic_0001>
module attributes {stable_mosaic.version = 11 : i64} {
  func.func @jointnet_kernel(%arg0: memref<8x32xf32, #tpu.memory_space<vmem>>, %arg1: memref<32x24xf32, #tpu.memory_space<vmem>>, %arg2: memref<8x24xf32, #tpu.memory_space<vmem>>, %arg3: memref<8x24xf32, #tpu.memory_space<vmem>>) attributes {dimension_semantics = [], scalar_prefetch = 0 : i64, scratch_operands = 0 : i64, tpu.core_type = #tpu.core_type<tc>} {
    %c0 = arith.constant 0 : index
    %c0_0 = arith.constant 0 : index
    %0 = vector.load %arg0[%c0, %c0_0] : memref<8x32xf32, #tpu.memory_space<vmem>>, vector<8x32xf32>
    %c0_1 = arith.constant 0 : index
    %c0_2 = arith.constant 0 : index
    %1 = vector.load %arg1[%c0_1, %c0_2] : memref<32x24xf32, #tpu.memory_space<vmem>>, vector<32x24xf32>
    %cst = arith.constant dense<0.000000e+00> : vector<8x24xf32>
    %2 = tpu.matmul %0, %1, %cst {dimension_numbers = #tpu.dot_dimension_numbers<[1], [0], [0], [1], [0, 0, 1, 1], [], []>} : vector<8x32xf32>, vector<32x24xf32>, vector<8x24xf32> -> vector<8x24xf32>
    %c0_3 = arith.constant 0 : index
    %c0_4 = arith.constant 0 : index
    %3 = vector.load %arg2[%c0_3, %c0_4] : memref<8x24xf32, #tpu.memory_space<vmem>>, vector<8x24xf32>
    %4 = arith.addf %2, %3 : vector<8x24xf32>
    %c0_5 = arith.constant 0 : index
    %c0_6 = arith.constant 0 : index
    %5 = vector.load %arg3[%c0_5, %c0_6] : memref<8x24xf32, #tpu.memory_space<vmem>>, vector<8x24xf32>
    tpu.vector_store %arg3[%c0_5, %c0_6], %4 {strides = array<i32>} : memref<8x24xf32, #tpu.memory_space<vmem>>, vector<8x24xf32>,
    return
  }
}

</mosaic_0001>

<bundles_post_ra>
// kernel: tpu_custom_call.1
= control target key start
LH: loop header
LB: loop body
LE: loop exit
PB: predicated region body
PF: predicated region fallthrough
CT: control target
= control target key end

     0   :  { %v162_v3 = vmov 0.0|0.0   ;;  %vm163_vm0 = vmmov 0   ;;  %v164_v6 = vmov 0.0   ;;  %s216_s0 = inlined_call_operand.vmem [shape: f32[8,32], index: 0, kind: input, shape index: {}]   ;;  %s217_s1 = inlined_call_operand.vmem [shape: f32[32,24], index: 1, kind: input, shape index: {}]   ;;  %s218_s2 = inlined_call_operand.vmem [shape: f32[8,24], index: 2, kind: input, shape index: {}]   ;;  %s219_s3 = inlined_call_operand.hbm [shape: f32[8,24], index: 3, kind: output, shape index: {}]  }
   0x1   :  { %v16_v0 = vld [vmem:[%s217_s1] sm:$0xff]  ;;  %v17_v1 = vld [vmem:[%s217_s1 + $0x8] sm:$0xff]  ;;  %v18_v2 = vld [vmem:[%s217_s1 + $0x10] sm:$0xff]  ;;  %128 = vmatprep.subr.bf16.mxu0 %v162_v3  ;;  %125 = vmatprep.mubr.msk.f32.mxu0 %vm163_vm0, %v164_v6 }
   0x2   :  { %v129_v4 = vpack.c.bf16 %v17_v1, %v16_v0  ;;  %v19_v5 = vld [vmem:[%s217_s1 + $0x18] sm:$0xff] }
   0x3   :  { %8 = vsyncpa [#allocation3], 0  ;;  %v132_v7 = vpack.c.bf16 %v19_v5, %v18_v2  ;;  %v15_v8 = vld [vmem:[%s216_s0] sm:$0xff]  ;;  %vm21_vm1 = vcmask 261120   ;;  %s165_s24 = smov [#allocation2]   ;;  %vm95_vm2 = vcmask 195584  }
   0x4   :  { %130 = vmatpush3.bf16.msra.mxu0 %v129_v4  ;;  %v20_v9 = vld [vmem:[%s218_s2] sm:$0xff]  ;;  %s103_s1 = sshll.u32 %s165_s24, 4  ;;  %s104_s1 = int_to_ptr.vmem [resolvable:$true] %s103_s1 }
   0x5   :  { %131 = vmatprep.subr.bf16.mxu0 %v162_v3  ;;  %s138_s25 = scalar_lea.vmem %s104_s1, 128  ;;  %p143_p1 = scmp.lt.s32.totalorder %s104_s1, %s104_s1 }
   0x6   :  { %p139_p0 = scmp.ne.s32.totalorder %s104_s1, %s138_s25  ;;  %p144_p2 = scmp.lt.s32.totalorder %s138_s25, %s138_s25 }
   0x8   :  { %133 = vmatpush3.bf16.msra.mxu0 %v132_v7  ;;  %p145_p3 = por %p144_p2, %p143_p1 }
   0xa   :  { %p146_p4 = pnand %p145_p3, %p139_p0 }
   0xb   :  { %126 = vmatmul.mubr.msk.f32.vlgmr.msra.gmra.mrb[0].mxu0 %vm21_vm1, %v15_v8 }
  0xde   :  { %v91_v10 = vpop.f32.mrb[0].mxu0 }
  0xdf   :  { %v92_v11 = vadd.f32 %v91_v10, %v20_v9  ;;  %v127_v12 = vpop.f32.mrb[1].mxu0 }
  0xe1   :  { %96 = vst.msk [vmem:[#allocation2] sm:$0xff] %vm95_vm2, %v92_v11 }
  0xe2   :  { %149 = shalt.err (!%p146_p4)
}
  0xe3   :  { %s150_s27 = scalar_lea.hbm %s219_s3, 128 }
  0xe4   :  { %p151_p5 = scmp.ne.s32.totalorder %s219_s3, %s150_s27  ;;  %p154_p6 = scmp.lt.u32.totalorder %s150_s27, %s219_s3 }
  0xe6   :  { %p156_p7 = pnand %p154_p6, %p151_p5 }
  0xe8   :  { %159 = shalt.err (!%p156_p7)
}
  0xe9   :  { %106 = dma.vmem_to_hbm [thread:$0]  %s104_s1, 128, %s219_s3, [#allocation3]  }
  0xea   :  { %160 = dma.done.wait [#allocation3], 128  }
  0xeb   :  { %161 = vsyncadd [#allocation3], 4294967168 }
  0xec   :  { %110 = vsyncpa [#allocation3], 1 }

</bundles_post_ra>
